<compile_context>
chip_gen: v7x
topology: tpu7x:2x2x1
jax: 0.10.0
libtpu: 0.0.40
codegen_flags: <defaults>
</compile_context>

<pallas_src>
import jax
import jax.numpy as jnp
from jax.experimental import pallas as pl
from jax.experimental.pallas import tpu as pltpu


def _nonlocal_kernel(x_ref, wgtp_ref, bgtp_ref, ww_ref, wb_ref, z_ref):
    # x_ref   : (1, C, N)   f32   one batch element, channels-first
    # wgtp_ref: (3*CP, C)   bf16  fused [g; theta; phi] 1x1-conv weights
    #                             (each block zero-padded from Ci to CP rows)
    # bgtp_ref: (3*CP, 1)   f32   fused biases (zero in padded rows)
    # ww_ref  : (C, CP)     bf16  W-conv weight, input side zero-padded to CP
    # wb_ref  : (C, 1)      f32   W-conv bias
    # z_ref   : (1, C, N)   f32   output (lane-dense store over N)
    cp = ww_ref.shape[1]
    x = x_ref[0]                                    # (C, N) f32
    x16 = x.astype(jnp.bfloat16)

    # Fused g/theta/phi projections: one bf16 MXU pass, f32 accumulation.
    gtp = jnp.dot(wgtp_ref[...], x16,
                  preferred_element_type=jnp.float32) + bgtp_ref[...]   # (3*CP, N)
    g = gtp[0:cp]                                   # (CP, N); rows >= Ci are exact 0
    t = gtp[cp:2 * cp]                              # (CP, N)
    p = gtp[2 * cp:3 * cp]                          # (CP, N)

    # f[i, j] = <theta[:, i], phi[:, j]>  -> (N, N). Zero-padded channels add 0.
    # (small aligned (CP, N) -> (N, CP) transpose; matmul itself is standard NN)
    f = jnp.dot(t.T.astype(jnp.bfloat16), p.astype(jnp.bfloat16),
                preferred_element_type=jnp.float32)

    # softmax over axis 0 == PyTorch F.softmax(f, dim=1); sublane reductions,
    # no (N, N) transpose. Normalize via EUP reciprocal of the (1, N) denom.
    f = f - jnp.max(f, axis=0, keepdims=True)
    e = jnp.exp(f)
    denom = jnp.sum(e, axis=0, keepdims=True)               # (1, N)
    attn = e * pl.reciprocal(denom, approx=True)            # (N, N) f32

    # y[c, i] = sum_j g[c, j] * attn[i, j]  -> (CP, N)   (rhs-transposed matmul)
    y = jax.lax.dot_general(
        g.astype(jnp.bfloat16), attn.astype(jnp.bfloat16),
        dimension_numbers=(((1,), (1,)), ((), ())),
        preferred_element_type=jnp.float32)

    # W projection + residual; (C, N) store with N on lanes is unmasked/dense.
    w_y = jnp.dot(ww_ref[...], y.astype(jnp.bfloat16),
                  preferred_element_type=jnp.float32) + wb_ref[...]     # (C, N)
    z_ref[0] = w_y + x


def nonlocal_block_2d(x, params):
    """x: (B, C, H, W) float32 NCHW (like PyTorch). Returns (B, C, H, W) float32."""
    B, C, H, W = x.shape
    Ci = params["g_w"].shape[0]
    assert Ci == C, "forward() only type-checks when inter_channels == in_channels"
    N = H * W
    assert N % 128 == 0, "H*W must be a multiple of 128 for the lane-dense layout"
    CP = ((Ci + 7) // 8) * 8      # pad inter-channels to a full sublane tile

    # NCHW -> (B, C, N): pure reshape, no HBM transpose round trip.
    x_flat = x.reshape(B, C, N).astype(jnp.float32)

    def pad_proj(name):
        w = jnp.zeros((CP, C), jnp.float32).at[:Ci, :].set(params[name + "_w"])
        b = jnp.zeros((CP, 1), jnp.float32).at[:Ci, 0].set(params[name + "_b"])
        return w, b

    gw, gb = pad_proj("g")
    tw, tb = pad_proj("theta")
    pw, pb = pad_proj("phi")
    wgtp = jnp.concatenate([gw, tw, pw], axis=0).astype(jnp.bfloat16)   # (3*CP, C)
    bgtp = jnp.concatenate([gb, tb, pb], axis=0)                         # (3*CP, 1)
    wwp = jnp.zeros((C, CP), jnp.float32).at[:, :Ci].set(
        params["W_w"]).astype(jnp.bfloat16)                              # (C, CP)
    wb = params["W_b"].reshape(C, 1).astype(jnp.float32)                 # (C, 1)

    z_flat = pl.pallas_call(
        _nonlocal_kernel,
        out_shape=jax.ShapeDtypeStruct((B, C, N), jnp.float32),
        grid_spec=pltpu.PrefetchScalarGridSpec(
            num_scalar_prefetch=0,
            grid=(B,),
            in_specs=[
                pl.BlockSpec((1, C, N), lambda b: (b, 0, 0)),      # x
                pl.BlockSpec((3 * CP, C), lambda b: (0, 0)),       # fused g/theta/phi W
                pl.BlockSpec((3 * CP, 1), lambda b: (0, 0)),       # fused bias
                pl.BlockSpec((C, CP), lambda b: (0, 0)),           # W weight (padded)
                pl.BlockSpec((C, 1), lambda b: (0, 0)),            # W bias
            ],
            out_specs=pl.BlockSpec((1, C, N), lambda b: (b, 0, 0)),
        ),
        # Batch axis is parallel -> maps across TensorCores on v7x megacore.
        # (If B == 1 at deployment, split the theta-row axis instead.)
        compiler_params=pltpu.CompilerParams(
            dimension_semantics=("parallel",)),
    )(x_flat, wgtp, bgtp, wwp, wb)

    # (B, C, N) -> NCHW: pure reshape.
    return z_flat.reshape(B, C, H, W)


def init_params(key, in_channels, inter_channels):
    """Deterministic init mimicking PyTorch Conv2d default (uniform +-1/sqrt(fan_in))."""
    bound = 1.0 / jnp.sqrt(jnp.float32(in_channels))  # kernel_size = 1
    names = ["g", "W", "theta", "phi"]
    keys = jax.random.split(key, 2 * len(names))
    params = {}
    for i, name in enumerate(names):
        params[name + "_w"] = jax.random.uniform(
            keys[2 * i], (inter_channels, in_channels),
            minval=-bound, maxval=bound, dtype=jnp.float32)
        params[name + "_b"] = jax.random.uniform(
            keys[2 * i + 1], (inter_channels,),
            minval=-bound, maxval=bound, dtype=jnp.float32)
    return params


def reference_forward(x, params):
    """Pure-JAX f32 reference replicating the PyTorch forward exactly."""
    B, C, H, W = x.shape
    Ci = params["g_w"].shape[0]

    def conv1x1(inp, w, b):  # w: (out, in)
        return jnp.einsum("bchw,oc->bohw", inp, w) + b[None, :, None, None]

    g_x = conv1x1(x, params["g_w"], params["g_b"]).reshape(B, Ci, -1).transpose(0, 2, 1)
    theta_x = conv1x1(x, params["theta_w"], params["theta_b"]).reshape(B, Ci, -1).transpose(0, 2, 1)
    phi_x = conv1x1(x, params["phi_w"], params["phi_b"]).reshape(B, Ci, -1)
    f = jnp.matmul(theta_x, phi_x)
    f_div_c = jax.nn.softmax(f, axis=1)
    y = jnp.matmul(f_div_c, g_x)
    y = y.transpose(0, 2, 1).reshape(B, Ci, H, W)
    w_y = conv1x1(y, params["W_w"], params["W_b"])
    return w_y + x


def reference_forward_mixed(x, params):
    """Pure-JAX reference mirroring the kernel's bf16 cast points (f32 accumulation)."""
    B, C, H, W = x.shape
    Ci = params["g_w"].shape[0]
    N = H * W
    bf = jnp.bfloat16
    wgtp = jnp.concatenate(
        [params["g_w"], params["theta_w"], params["phi_w"]], axis=0).astype(bf)
    bgtp = jnp.concatenate(
        [params["g_b"], params["theta_b"], params["phi_b"]], axis=0)[:, None]
    ww = params["W_w"].astype(bf)
    wb = params["W_b"][:, None]

    def one(xcn):  # (C, N) f32
        gtp = jnp.dot(wgtp, xcn.astype(bf), preferred_element_type=jnp.float32) + bgtp
        g, t, p = gtp[:Ci], gtp[Ci:2 * Ci], gtp[2 * Ci:]
        f = jnp.dot(t.T.astype(bf), p.astype(bf), preferred_element_type=jnp.float32)
        f = f - jnp.max(f, axis=0, keepdims=True)
        e = jnp.exp(f)
        attn = e / jnp.sum(e, axis=0, keepdims=True)
        y = jax.lax.dot_general(g.astype(bf), attn.astype(bf),
                                dimension_numbers=(((1,), (1,)), ((), ())),
                                preferred_element_type=jnp.float32)
        w_y = jnp.dot(ww, y.astype(bf), preferred_element_type=jnp.float32) + wb
        return w_y + xcn

    z = jax.vmap(one)(x.reshape(B, C, N))
    return z.reshape(B, C, H, W)


if __name__ == "__main__":
    B, C, H, W = 2, 4, 16, 16          # in_channels == inter_channels == 4, N = 256
    key = jax.random.PRNGKey(0)
    k_x, k_p = jax.random.split(key)
    x = jax.random.normal(k_x, (B, C, H, W), dtype=jnp.float32)
    params = init_params(k_p, in_channels=C, inter_channels=C)

    z = nonlocal_block_2d(x, params)
    z = jax.block_until_ready(z)
    assert z.shape == (B, C, H, W)

    # Tight check vs a pure-JAX reference with the SAME bf16 cast points
    # (only differences: MXU accumulation order, EUP exp/approx-reciprocal).
    z_mixed = reference_forward_mixed(x, params)
    assert jnp.allclose(z, z_mixed, atol=2e-2, rtol=2e-2), "mismatch vs bf16-matched reference"

    # Loose sanity check vs the exact f32 PyTorch-equivalent math
    # (tolerance accounts for bf16 MXU operands inside the kernel).
    z_ref = reference_forward(x, params)
    assert jnp.allclose(z, z_ref, atol=2e-1, rtol=1e-1), "mismatch vs f32 reference"

    print("KERNEL_OK")
</pallas_src>

<mosaic_0001>
module attributes {stable_mosaic.version = 11 : i64} {
  func.func @_nonlocal_kernel(%arg0: i32, %arg1: memref<1x4x256xf32, #tpu.memory_space<vmem>>, %arg2: memref<24x4xbf16, #tpu.memory_space<vmem>>, %arg3: memref<24x1xf32, #tpu.memory_space<vmem>>, %arg4: memref<4x8xbf16, #tpu.memory_space<vmem>>, %arg5: memref<4x1xf32, #tpu.memory_space<vmem>>, %arg6: memref<1x4x256xf32, #tpu.memory_space<vmem>>) attributes {dimension_semantics = [#tpu.dimension_semantics<parallel>], iteration_bounds = array<i64: 2>, scalar_prefetch = 0 : i64, scratch_operands = 0 : i64, tpu.core_type = #tpu.core_type<tc>, window_params = [{transform_indices = @transform_0, window_bounds = array<i64: 1, 4, 256>}, {pipeline_mode = #tpu.pipeline_mode<synchronous>, transform_indices = @transform_1, window_bounds = array<i64: 24, 4>}, {pipeline_mode = #tpu.pipeline_mode<synchronous>, transform_indices = @transform_2, window_bounds = array<i64: 24, 1>}, {pipeline_mode = #tpu.pipeline_mode<synchronous>, transform_indices = @transform_3, window_bounds = array<i64: 4, 8>}, {pipeline_mode = #tpu.pipeline_mode<synchronous>, transform_indices = @transform_4, window_bounds = array<i64: 4, 1>}, {transform_indices = @transform_5, window_bounds = array<i64: 1, 4, 256>}]} {
    %c0 = arith.constant 0 : index
    %c0_0 = arith.constant 0 : index
    %c0_1 = arith.constant 0 : index
    %0 = vector.load %arg1[%c0, %c0_0, %c0_1] : memref<1x4x256xf32, #tpu.memory_space<vmem>>, vector<1x4x256xf32>
    %1 = vector.shape_cast %0 : vector<1x4x256xf32> to vector<4x256xf32>
    %2 = arith.truncf %1 : vector<4x256xf32> to vector<4x256xbf16>
    %c0_2 = arith.constant 0 : index
    %c0_3 = arith.constant 0 : index
    %3 = vector.load %arg2[%c0_2, %c0_3] : memref<24x4xbf16, #tpu.memory_space<vmem>>, vector<24x4xbf16>
    %cst = arith.constant dense<0.000000e+00> : vector<24x256xf32>
    %4 = tpu.matmul %3, %2, %cst {dimension_numbers = #tpu.dot_dimension_numbers<[1], [0], [0], [1], [0, 0, 1, 1], [], []>} : vector<24x4xbf16>, vector<4x256xbf16>, vector<24x256xf32> -> vector<24x256xf32>
    %c0_4 = arith.constant 0 : index
    %c0_5 = arith.constant 0 : index
    %5 = vector.load %arg3[%c0_4, %c0_5] : memref<24x1xf32, #tpu.memory_space<vmem>>, vector<24x1xf32>
    %6 = vector.broadcast %5 : vector<24x1xf32> to vector<24x256xf32>
    %7 = arith.addf %4, %6 : vector<24x256xf32>
    %8 = vector.extract_strided_slice %7 {offsets = [0, 0], sizes = [8, 256], strides = [1, 1]} : vector<24x256xf32> to vector<8x256xf32>
    %9 = vector.extract_strided_slice %7 {offsets = [8, 0], sizes = [8, 256], strides = [1, 1]} : vector<24x256xf32> to vector<8x256xf32>
    %10 = vector.extract_strided_slice %7 {offsets = [16, 0], sizes = [8, 256], strides = [1, 1]} : vector<24x256xf32> to vector<8x256xf32>
    %11 = tpu.transpose %9, [1, 0] : vector<8x256xf32> -> vector<256x8xf32>
    %12 = arith.truncf %11 : vector<256x8xf32> to vector<256x8xbf16>
    %13 = arith.truncf %10 : vector<8x256xf32> to vector<8x256xbf16>
    %cst_6 = arith.constant dense<0.000000e+00> : vector<256x256xf32>
    %14 = tpu.matmul %12, %13, %cst_6 {dimension_numbers = #tpu.dot_dimension_numbers<[1], [0], [0], [1], [0, 0, 1, 1], [], []>} : vector<256x8xbf16>, vector<8x256xbf16>, vector<256x256xf32> -> vector<256x256xf32>
    %cst_7 = arith.constant dense<0xFF800000> : vector<256xf32>
    %15 = vector.multi_reduction <maximumf>, %14, %cst_7 [0] : vector<256x256xf32> to vector<256xf32>
    %16 = vector.shape_cast %15 : vector<256xf32> to vector<1x256xf32>
    %17 = vector.broadcast %16 : vector<1x256xf32> to vector<256x256xf32>
    %18 = arith.subf %14, %17 : vector<256x256xf32>
    %19 = math.exp %18 : vector<256x256xf32>
    %cst_8 = arith.constant dense<0.000000e+00> : vector<256xf32>
    %20 = vector.multi_reduction <add>, %19, %cst_8 [0] : vector<256x256xf32> to vector<256xf32>
    %21 = vector.shape_cast %20 : vector<256xf32> to vector<1x256xf32>
    %22 = tpu.reciprocal %21 {approx = true} : vector<1x256xf32> -> vector<1x256xf32>
    %23 = vector.broadcast %22 : vector<1x256xf32> to vector<256x256xf32>
    %24 = arith.mulf %19, %23 : vector<256x256xf32>
    %25 = arith.truncf %8 : vector<8x256xf32> to vector<8x256xbf16>
    %26 = arith.truncf %24 : vector<256x256xf32> to vector<256x256xbf16>
    %cst_9 = arith.constant dense<0.000000e+00> : vector<8x256xf32>
    %27 = tpu.matmul %25, %26, %cst_9 {dimension_numbers = #tpu.dot_dimension_numbers<[1], [1], [0], [0], [0, 0, 1, 0], [], []>} : vector<8x256xbf16>, vector<256x256xbf16>, vector<8x256xf32> -> vector<8x256xf32>
    %c0_10 = arith.constant 0 : index
    %c0_11 = arith.constant 0 : index
    %28 = vector.load %arg4[%c0_10, %c0_11] : memref<4x8xbf16, #tpu.memory_space<vmem>>, vector<4x8xbf16>
    %29 = arith.truncf %27 : vector<8x256xf32> to vector<8x256xbf16>
    %cst_12 = arith.constant dense<0.000000e+00> : vector<4x256xf32>
    %30 = tpu.matmul %28, %29, %cst_12 {dimension_numbers = #tpu.dot_dimension_numbers<[1], [0], [0], [1], [0, 0, 1, 1], [], []>} : vector<4x8xbf16>, vector<8x256xbf16>, vector<4x256xf32> -> vector<4x256xf32>
    %c0_13 = arith.constant 0 : index
    %c0_14 = arith.constant 0 : index
    %31 = vector.load %arg5[%c0_13, %c0_14] : memref<4x1xf32, #tpu.memory_space<vmem>>, vector<4x1xf32>
    %32 = vector.broadcast %31 : vector<4x1xf32> to vector<4x256xf32>
    %33 = arith.addf %30, %32 : vector<4x256xf32>
    %34 = arith.addf %33, %1 : vector<4x256xf32>
    %c0_15 = arith.constant 0 : index
    %c0_16 = arith.constant 0 : index
    %c0_17 = arith.constant 0 : index
    %35 = vector.load %arg6[%c0_15, %c0_16, %c0_17] : memref<1x4x256xf32, #tpu.memory_space<vmem>>, vector<1x4x256xf32>
    %36 = vector.shape_cast %35 : vector<1x4x256xf32> to vector<4x256xf32>
    %37 = vector.shape_cast %34 : vector<4x256xf32> to vector<1x4x256xf32>
    tpu.vector_store %arg6[%c0_15, %c0_16, %c0_17], %37 {strides = array<i32>} : memref<1x4x256xf32, #tpu.memory_space<vmem>>, vector<1x4x256xf32>,
    return
  }
  func.func @transform_0(%arg0: i32) -> (i32, i32, i32) {
    %c0_i32 = arith.constant 0 : i32
    %c0_i32_0 = arith.constant 0 : i32
    %c0_i32_1 = arith.constant 0 : i32
    return %arg0, %c0_i32, %c0_i32_0 : i32, i32, i32
  }
  func.func @transform_1(%arg0: i32) -> (i32, i32) {
    %c0_i32 = arith.constant 0 : i32
    %c0_i32_0 = arith.constant 0 : i32
    %c0_i32_1 = arith.constant 0 : i32
    return %c0_i32, %c0_i32_0 : i32, i32
  }
  func.func @transform_2(%arg0: i32) -> (i32, i32) {
    %c0_i32 = arith.constant 0 : i32
    %c0_i32_0 = arith.constant 0 : i32
    %c0_i32_1 = arith.constant 0 : i32
    return %c0_i32, %c0_i32_0 : i32, i32
  }
  func.func @transform_3(%arg0: i32) -> (i32, i32) {
    %c0_i32 = arith.constant 0 : i32
    %c0_i32_0 = arith.constant 0 : i32
    %c0_i32_1 = arith.constant 0 : i32
    return %c0_i32, %c0_i32_0 : i32, i32
  }
  func.func @transform_4(%arg0: i32) -> (i32, i32) {
    %c0_i32 = arith.constant 0 : i32
    %c0_i32_0 = arith.constant 0 : i32
    %c0_i32_1 = arith.constant 0 : i32
    return %c0_i32, %c0_i32_0 : i32, i32
  }
  func.func @transform_5(%arg0: i32) -> (i32, i32, i32) {
    %c0_i32 = arith.constant 0 : i32
    %c0_i32_0 = arith.constant 0 : i32
    %c0_i32_1 = arith.constant 0 : i32
    return %arg0, %c0_i32, %c0_i32_0 : i32, i32, i32
  }
}

</mosaic_0001>

<bundles_post_ra>
// kernel: tpu_custom_call.1
= control target key start
LH: loop header
LB: loop body
LE: loop exit
PB: predicated region body
PF: predicated region fallthrough
CT: control target
= control target key end

     0   :  { %10 = vsyncpa [#allocation3], 0  ;;  %s2696_s0 = inlined_call_operand.vmem [shape: f32[2,4,256], index: 0, kind: input, shape index: {}]   ;;  %s2697_s1 = inlined_call_operand.vmem [shape: bf16[24,4], index: 1, kind: input, shape index: {}]   ;;  %s2698_s2 = inlined_call_operand.vmem [shape: f32[24,1], index: 2, kind: input, shape index: {}]   ;;  %s2699_s3 = inlined_call_operand.vmem [shape: bf16[4,8], index: 3, kind: input, shape index: {}]   ;;  %s2700_s4 = inlined_call_operand.vmem [shape: f32[4,1], index: 4, kind: input, shape index: {}]   ;;  %s2701_s5 = inlined_call_operand.hbm [shape: f32[2,4,256], index: 5, kind: output, shape index: {}]  }
   0x1   :  { %12 = vsyncpa [#allocation3 + $0x1], 0  ;;  %s1588_s18 = smov 0   ;;  %s1590_s19 = smov 0  }
   0x2   :  { %s1592_s20 = smov 0   ;;  %s1594_s21 = smov 0  }
   0x3 LB: > { %s1609_s22 = sadd.s32 4294967295, %s1554_s21   ;;  %s1276_s23 = sadd.s32 4294967294, %s1554_s21   ;;  %s1554_s21 = sphi %s1594_s21, %s2906_s21   ;;  %s1550_s20 = sphi %s1592_s20, %s2905_s20   ;;  %s1546_s19 = sphi %s1590_s19, %s2904_s19   ;;  %s1542_s18 = sphi %s1588_s18, %s2903_s18  }
   0x4   : > { %s1613_s24 = sadd.s32 1, %s1554_s21   ;;  %s135_s25 = sadd.s32 1, %s1550_s20 }
   0x5   : > { %s132_s26 = ssub.s32 %s1554_s21, %s1613_s24  ;;  %p145_p0 = scmp.ne.s32.totalorder %s1550_s20, %s1546_s19 }
   0x6   : > { %p133_p1 = scmp.eq.s32.totalorder %s132_s26, 0  ;;  %p146_p2 = scmp.eq.s32.totalorder %s1609_s22, 1 }
   0x7   : > { %p151_p3 = scmp.ne.s32.totalorder %s1546_s19, %s1542_s18  ;;  %p152_p4 = scmp.eq.s32.totalorder %s1276_s23, 1 }
   0x8   : > { %s1624_s27 = scalar_select %p133_p1, %s1550_s20, %s135_s25  }
   0x9   : > { %p1626_p5 = por %p146_p2, %p145_p0  ;;  %p1630_p6 = por %p152_p4, %p151_p3 }
   0xa   : > { %p1279_p7 = scmp.ge.s32.totalorder %s1554_s21, 1  ;;  %p190_p8 = scmp.lt.s32.totalorder %s1554_s21, 3 }
   0xc   : > { %p191_p9 = pnand %p1279_p7, %p190_p8 }
   0xe   : > { %194 = sbr.rel (%p191_p9) target bundleno = 1451 (0x5ab), region = 40 }
  0x15   : > { %p218_p10 = scmp.lt.s32.totalorder %s1609_s22, 1  ;;  %v1556_v0 = vmov 0   ;;  %v234_v1 = vld [vmem:[%s2698_s2 + $0x8] sm:$0xff]  ;;  %v235_v2 = vld [vmem:[%s2698_s2 + $0x10] sm:$0xff]  ;;  %vm266_vm0 = vcmask 1041408   ;;  %v233_v6 = vld [vmem:[%s2698_s2] sm:$0xff] }
  0x16   : > { %305 = vmatprep.mubr.bf16.mxu0 %v1556_v0  ;;  %1355 = vset.pattern.permute.xlu0 %v1556_v0  ;;  %v1357_v9 = vld [vmem:[%s2697_s1] sm:$0xff]   ;;  %vm259_vm1 = vcmask 31744   ;;  %v1358_v11 = vld [vmem:[%s2697_s1 + $0x8] ss:$0 sps:$4 sm:$0xff]   ;;  %vm455_vm2 = vcmask 1043456   ;;  %vm406_vm3 = vcmask 64512  }
  0x17   : > { %s219_s7 = scalar_select %p218_p10, %s1609_s22, 1  ;;  %243 = vperm.xlu0 %1355, %v234_v1   ;;  %494 = vmatprep.mubr.bf16.mxu1 %v1556_v0  ;;  %v1139_v10 = vld [vmem:[%s2700_s4] sm:$0xf] }
  0x18   : > { %s215_s8 = sand.u32 1, %s1546_s19  }
  0x19   : > { %s1312_s10 = sshll.u32 %s219_s7, 3  ;;  %s1280_s9 = sshll.u32 %s215_s8, 3 }
  0x1a   : > { %s1650_s13 = scalar_lea.vmem %s2696_s0, %s1312_s10  ;;  %s1313_s10 = sshll.u32 %s1609_s22, 7 }
  0x1b   : > { %v224_v3 = vld [vmem:[%s1650_s13] sm:$0xff]  ;;  %248 = vperm.xlu0 %1355, %v235_v2   ;;  %s217_s11 = scalar_lea.vmem [#allocation2], %s1280_s9  ;;  %s2654_s16 = scalar_lea.hbm %s2701_s5, %s1313_s10 }
  0x1c   : > { %v1653_v4 = vcombine.high %v224_v3, %v224_v3  ;;  %v228_v5 = vpack.c.bf16 %v224_v3, %v224_v3  ;;  %s1217_s12 = sshll.u32 %s217_s11, 4  ;;  %s1557_s22 = smov [#allocation2]   ;;  %s2656_s12 = int_to_ptr.vmem [resolvable:$true] %s1217_s12 }
  0x1d   : > { %s1492_s17 = scalar_lea.vmem %s2656_s12, 128  ;;  %s1496_s23 = sshll.u32 %s1557_s22, 4  ;;  %s1497_s23 = int_to_ptr.vmem [resolvable:$false] %s1496_s23 }
  0x1e   : > { %2762 = vst [vmem:[#allocation5_spill] sm:$0xff] %v1653_v4  ;;  %v229_v7 = vpack.c.bf16 %v1653_v4, %v1653_v4  ;;  %v268_v8 = vsel %vm266_vm0, %v228_v5, 0  ;;  %p1493_p11 = scmp.ne.s32.totalorder %s2656_s12, %s1492_s17  ;;  %s1498_s25 = scalar_lea.vmem %s1497_s23, 256 }
  0x1f   : > { %238 = vperm.xlu0 %1355, %v233_v6   ;;  %p1499_p0 = scmp.lt.s32.totalorder %s2656_s12, %s1497_s23  ;;  %p1500_p1 = scmp.lt.s32.totalorder %s1498_s25, %s1492_s17 }
  0x20   : > { %1285 = vmatprep.subr.msk.bf16.mxu0 %vm266_vm0, %v229_v7  ;;  %p1494_p12 = pnand %p1493_p11, %p1626_p5 }
  0x21   : > { %274 = vmatpush1.bf16.msra.mxu0 %v268_v8  ;;  %p1501_p2 = por %p1500_p1, %p1499_p0 }
  0x22   : > { %p1495_p13 = pneg %p1494_p12 }
  0x23   : > { %1142 = vperm.xlu0 %1355, %v1139_v10  }
  0x24   : > { %1286 = vmatmul.mubr.msk.bf16.vlgmr.msra.gmra.mrb[0].mxu0 %vm259_vm1, %v1357_v9  ;;  %p1502_p3 = pnand %p1501_p2, %p1495_p13 }
  0x25   : > { %315 = vmatprep.mubr.bf16.mxu0 %v1556_v0 }
  0x2c   : > { %1287 = vmatmul.mubr.msk.bf16.gmra.mrb[4].mxu0 %vm259_vm1, %v1358_v11 }
  0x96   : > { %v244_v12 = vpop.permute.xlu0 %243 }
  0x9a   : > { %v249_v13 = vpop.permute.xlu0 %248 }
  0x9e   : > { %v1672_v15 = vpop.permute.xlu0 %238 }
  0x9f   : > { %2764 = vst [vmem:[#allocation7_spill] sm:$0xff] %v1672_v15 }
  0xf7   : > { %v1670_v14 = vpop.f32.mrb[0].mxu0 }
  0xf8   : > { %2763 = vst [vmem:[#allocation6_spill] sm:$0xff] %v1670_v14  ;;  %v309_v16 = vpop.f32.mrb[1].mxu0 }
  0xf9   : > { %v310_v17 = vadd.f32 %v309_v16, %v1672_v15  ;;  %v311_v18 = vpop.f32.mrb[2].mxu0 }
  0xfa   : > { %v313_v19 = vpop.f32.mrb[3].mxu0  ;;  %v312_v20 = vadd.f32 %v311_v18, %v244_v12 }
  0xfb   : > { %v1062_v21 = vpack.c.bf16 %v310_v17, %v310_v17  ;;  %v314_v31 = vadd.f32 %v313_v19, %v244_v12 }
  0xfc   : > { %324 = vxpose.xlu1.b32.start.end [1/1] (short) %v312_v20, 128 }
  0xfd   : > { %1127 = vmatprep.mubr.bf16.mxu0 %v1062_v21 }
  0xff   : > { %v317_v22 = vpop.f32.mrb[4].mxu0 }
 0x100   : > { %v318_v23 = vadd.f32 %v317_v22, %v249_v13  ;;  %v319_v24 = vpop.f32.mrb[5].mxu0 }
 0x101   : > { %v320_v25 = vadd.f32 %v319_v24, %v249_v13  ;;  %v321_v26 = vpop.f32.mrb[6].mxu0 }
 0x102   : > { %v404_v27 = vpack.c.bf16 %v318_v23, %v318_v23  ;;  %v322_v28 = vpop.f32.mrb[7].mxu0 }
 0x103   : > { %v405_v29 = vpack.c.bf16 %v320_v25, %v320_v25 }
 0x104   : > { %v457_v30 = vsel %vm455_vm2, %v404_v27, 0 }
 0x105   : > { %1288 = vmatprep.subr.msk.bf16.mxu1 %vm455_vm2, %v405_v29 }
 0x106   : > { %463 = vmatpush1.bf16.msra.mxu1 %v457_v30 }
 0x139   : > { %356 = vxpose.xlu1.b32.start.end [1/1] (short) %v314_v31, 128 }
 0x17c   : > { %v340_v32 = vpop.trf.xlu1 }
 0x180   : > { %v341_v33 = vpop.trf.xlu1 }
 0x181   : > { %v388_v34 = vpack.c.bf16 %v341_v33, %v340_v32 }
 0x183   : > { %1289 = vmatmul.mubr.msk.bf16.vlgmr.msra.gmra.mrb[0].mxu1 %vm406_vm3, %v388_v34 }
 0x184   : > { %v342_v35 = vpop.trf.xlu1  ;;  %504 = vmatprep.mubr.bf16.mxu1 %v1556_v0 }
 0x188   : > { %v343_v36 = vpop.trf.xlu1 }
 0x189   : > { %v389_v37 = vpack.c.bf16 %v343_v36, %v342_v35 }
 0x18b   : > { %1290 = vmatmul.mubr.msk.bf16.gmra.mrb[4].mxu1 %vm406_vm3, %v389_v37 }
 0x18c   : > { %v344_v38 = vpop.trf.xlu1  ;;  %514 = vmatprep.mubr.bf16.mxu1 %v1556_v0 }
 0x190   : > { %v345_v39 = vpop.trf.xlu1 }
 0x191   : > { %v390_v40 = vpack.c.bf16 %v345_v39, %v344_v38 }
 0x193   : > { %1291 = vmatmul.mubr.msk.bf16.gmra.mrb[8].mxu1 %vm406_vm3, %v390_v40 }
 0x194   : > { %v346_v41 = vpop.trf.xlu1  ;;  %524 = vmatprep.mubr.bf16.mxu1 %v1556_v0 }
 0x198   : > { %v347_v42 = vpop.trf.xlu1 }
 0x199   : > { %v391_v43 = vpack.c.bf16 %v347_v42, %v346_v41 }
 0x19b   : > { %1292 = vmatmul.mubr.msk.bf16.gmra.mrb[12].mxu1 %vm406_vm3, %v391_v43 }
 0x19c   : > { %v348_v44 = vpop.trf.xlu1  ;;  %534 = vmatprep.mubr.bf16.mxu1 %v1556_v0 }
 0x1a0   : > { %v349_v45 = vpop.trf.xlu1 }
 0x1a1   : > { %v392_v46 = vpack.c.bf16 %v349_v45, %v348_v44 }
 0x1a3   : > { %1293 = vmatmul.mubr.msk.bf16.gmra.mrb[16].mxu1 %vm406_vm3, %v392_v46 }
 0x1a4   : > { %v350_v47 = vpop.trf.xlu1  ;;  %544 = vmatprep.mubr.bf16.mxu1 %v1556_v0 }
 0x1a8   : > { %v351_v48 = vpop.trf.xlu1 }
 0x1a9   : > { %v393_v49 = vpack.c.bf16 %v351_v48, %v350_v47 }
 0x1ab   : > { %1294 = vmatmul.mubr.msk.bf16.gmra.mrb[20].mxu1 %vm406_vm3, %v393_v49 }
 0x1ac   : > { %v352_v50 = vpop.trf.xlu1  ;;  %554 = vmatprep.mubr.bf16.mxu1 %v1556_v0 }
 0x1b0   : > { %v353_v51 = vpop.trf.xlu1 }
 0x1b1   : > { %v394_v52 = vpack.c.bf16 %v353_v51, %v352_v50 }
 0x1b3   : > { %1295 = vmatmul.mubr.msk.bf16.gmra.mrb[24].mxu1 %vm406_vm3, %v394_v52 }
 0x1b4   : > { %v354_v53 = vpop.trf.xlu1  ;;  %564 = vmatprep.mubr.bf16.mxu1 %v1556_v0 }
 0x1b8   : > { %v355_v54 = vpop.trf.xlu1 }
 0x1b9   : > { %v395_v55 = vpack.c.bf16 %v355_v54, %v354_v53 }
 0x1bb   : > { %1296 = vmatmul.mubr.msk.bf16.gmra.mrb[28].mxu1 %vm406_vm3, %v395_v55 }
 0x1bc   : > { %v372_v56 = vpop.trf.xlu1  ;;  %574 = vmatprep.mubr.bf16.mxu1 %v1556_v0 }
 0x1c0   : > { %v373_v57 = vpop.trf.xlu1 }
 0x1c1   : > { %v396_v58 = vpack.c.bf16 %v373_v57, %v372_v56 }
 0x1c3   : > { %1297 = vmatmul.mubr.msk.bf16.gmra.mrb[32].mxu1 %vm406_vm3, %v396_v58 }
 0x1c4   : > { %v374_v59 = vpop.trf.xlu1  ;;  %584 = vmatprep.mubr.bf16.mxu1 %v1556_v0 }
 0x1c8   : > { %v375_v60 = vpop.trf.xlu1 }
 0x1c9   : > { %v397_v61 = vpack.c.bf16 %v375_v60, %v374_v59 }
 0x1cb   : > { %1298 = vmatmul.mubr.msk.bf16.gmra.mrb[36].mxu1 %vm406_vm3, %v397_v61 }
 0x1cc   : > { %v376_v62 = vpop.trf.xlu1  ;;  %594 = vmatprep.mubr.bf16.mxu1 %v1556_v0 }
 0x1d0   : > { %v377_v63 = vpop.trf.xlu1 }
 0x1d1   : > { %v398_v1 = vpack.c.bf16 %v377_v63, %v376_v62 }
 0x1d3   : > { %1299 = vmatmul.mubr.msk.bf16.gmra.mrb[40].mxu1 %vm406_vm3, %v398_v1 }
 0x1d4   : > { %v378_v2 = vpop.trf.xlu1  ;;  %604 = vmatprep.mubr.bf16.mxu1 %v1556_v0 }
 0x1d8   : > { %v379_v3 = vpop.trf.xlu1 }
 0x1d9   : > { %v399_v5 = vpack.c.bf16 %v379_v3, %v378_v2 }
 0x1db   : > { %1300 = vmatmul.mubr.msk.bf16.gmra.mrb[44].mxu1 %vm406_vm3, %v399_v5 }
 0x1dc   : > { %v380_v6 = vpop.trf.xlu1  ;;  %614 = vmatprep.mubr.bf16.mxu1 %v1556_v0 }
 0x1e0   : > { %v381_v7 = vpop.trf.xlu1 }
 0x1e1   : > { %v400_v8 = vpack.c.bf16 %v381_v7, %v380_v6 }
 0x1e3   : > { %1301 = vmatmul.mubr.msk.bf16.gmra.mrb[48].mxu1 %vm406_vm3, %v400_v8 }
 0x1e4   : > { %v382_v9 = vpop.trf.xlu1  ;;  %624 = vmatprep.mubr.bf16.mxu1 %v1556_v0 }
 0x1e8   : > { %v383_v10 = vpop.trf.xlu1 }
 0x1e9   : > { %v401_v11 = vpack.c.bf16 %v383_v10, %v382_v9 }
 0x1eb   : > { %1302 = vmatmul.mubr.msk.bf16.gmra.mrb[52].mxu1 %vm406_vm3, %v401_v11 }
 0x1ec   : > { %v384_v12 = vpop.trf.xlu1  ;;  %634 = vmatprep.mubr.bf16.mxu1 %v1556_v0 }
 0x1f0   : > { %v385_v13 = vpop.trf.xlu1 }
 0x1f1   : > { %v402_v16 = vpack.c.bf16 %v385_v13, %v384_v12 }
 0x1f3   : > { %1303 = vmatmul.mubr.msk.bf16.gmra.mrb[56].mxu1 %vm406_vm3, %v402_v16 }
 0x1f4   : > { %v386_v17 = vpop.trf.xlu1  ;;  %644 = vmatprep.mubr.bf16.mxu1 %v1556_v0 }
 0x1f8   : > { %v387_v18 = vpop.trf.xlu1 }
 0x1f9   : > { %v403_v19 = vpack.c.bf16 %v387_v18, %v386_v17 }
 0x1fb   : > { %1304 = vmatmul.mubr.msk.bf16.gmra.mrb[60].mxu1 %vm406_vm3, %v403_v19 }
 0x1fc   : > { %1186 = vmatprep.mubr.bf16.mxu1 %v1556_v0 }
 0x256   : > { %v1709_v20 = vpop.f32.mrb[0].mxu1 }
 0x257   : > { %v1711_v21 = vpop.f32.mrb[1].mxu1 }
 0x258   : > { %v1713_v22 = vpop.f32.mrb[2].mxu1 }
 0x259   : > { %v1715_v23 = vpop.f32.mrb[3].mxu1 }
 0x25e   : > { %v1717_v24 = vpop.f32.mrb[4].mxu1 }
 0x25f   : > { %v655_v25 = vmax.f32 %v1709_v20, %v1717_v24  ;;  %v1721_v26 = vpop.f32.mrb[5].mxu1 }
 0x260   : > { %v692_v27 = vmax.f32 %v1711_v21, %v1721_v26  ;;  %v1725_v28 = vpop.f32.mrb[6].mxu1 }
 0x261   : > { %v656_v0 = vmax.f32 %v1713_v22, %v1725_v28  ;;  %v1729_v29 = vpop.f32.mrb[7].mxu1 }
 0x262   : > { %v693_v30 = vmax.f32 %v1715_v23, %v1729_v29 }
 0x266   : > { %v1733_v31 = vpop.f32.mrb[8].mxu1 }
 0x267   : > { %v657_v32 = vmax.f32 %v655_v25, %v1733_v31  ;;  %v1736_v33 = vpop.f32.mrb[9].mxu1 }
 0x268   : > { %v694_v34 = vmax.f32 %v692_v27, %v1736_v33  ;;  %v1739_v35 = vpop.f32.mrb[10].mxu1 }
 0x269   : > { %v658_v36 = vmax.f32 %v656_v0, %v1739_v35  ;;  %v1742_v37 = vpop.f32.mrb[11].mxu1 }
 0x26a   : > { %v695_v38 = vmax.f32 %v693_v30, %v1742_v37 }
 0x26e   : > { %v1745_v39 = vpop.f32.mrb[12].mxu1 }
 0x26f   : > { %v659_v40 = vmax.f32 %v657_v32, %v1745_v39  ;;  %v1748_v41 = vpop.f32.mrb[13].mxu1 }
 0x270   : > { %v696_v42 = vmax.f32 %v694_v34, %v1748_v41  ;;  %v1751_v43 = vpop.f32.mrb[14].mxu1 }
 0x271   : > { %v660_v44 = vmax.f32 %v658_v36, %v1751_v43  ;;  %v1754_v45 = vpop.f32.mrb[15].mxu1 }
 0x272   : > { %v697_v46 = vmax.f32 %v695_v38, %v1754_v45 }
 0x276   : > { %v1757_v47 = vpop.f32.mrb[16].mxu1 }
 0x277   : > { %v661_v48 = vmax.f32 %v659_v40, %v1757_v47  ;;  %v1760_v49 = vpop.f32.mrb[17].mxu1 }
 0x278   : > { %v698_v50 = vmax.f32 %v696_v42, %v1760_v49  ;;  %v1763_v51 = vpop.f32.mrb[18].mxu1 }
 0x279   : > { %v662_v52 = vmax.f32 %v660_v44, %v1763_v51  ;;  %v1766_v53 = vpop.f32.mrb[19].mxu1 }
 0x27a   : > { %v699_v54 = vmax.f32 %v697_v46, %v1766_v53 }
 0x27e   : > { %v1769_v55 = vpop.f32.mrb[20].mxu1 }
 0x27f   : > { %v663_v56 = vmax.f32 %v661_v48, %v1769_v55  ;;  %v1772_v57 = vpop.f32.mrb[21].mxu1 }
 0x280   : > { %v700_v58 = vmax.f32 %v698_v50, %v1772_v57  ;;  %v1775_v59 = vpop.f32.mrb[22].mxu1 }
 0x281   : > { %v664_v60 = vmax.f32 %v662_v52, %v1775_v59  ;;  %v1778_v61 = vpop.f32.mrb[23].mxu1 }
 0x282   : > { %2765 = vst [vmem:[#allocation8_spill] sm:$0xff] %v1778_v61  ;;  %v701_v62 = vmax.f32 %v699_v54, %v1778_v61 }
 0x286   : > { %v1781_v63 = vpop.f32.mrb[24].mxu1 }
 0x287   : > { %v665_v1 = vmax.f32 %v663_v56, %v1781_v63  ;;  %v1784_v2 = vpop.f32.mrb[25].mxu1 }
 0x288   : > { %2766 = vst [vmem:[#allocation9_spill] sm:$0xff] %v1784_v2  ;;  %v702_v3 = vmax.f32 %v700_v58, %v1784_v2  ;;  %v1787_v5 = vpop.f32.mrb[26].mxu1 }
 0x289   : > { %v666_v6 = vmax.f32 %v664_v60, %v1787_v5  ;;  %v1790_v7 = vpop.f32.mrb[27].mxu1 }
 0x28a   : > { %2767 = vst [vmem:[#allocation10_spill] sm:$0xff] %v1790_v7  ;;  %v703_v8 = vmax.f32 %v701_v62, %v1790_v7 }
 0x28e   : > { %v1793_v9 = vpop.f32.mrb[28].mxu1 }
 0x28f   : > { %v667_v10 = vmax.f32 %v665_v1, %v1793_v9  ;;  %v1796_v11 = vpop.f32.mrb[29].mxu1 }
 0x290   : > { %2768 = vst [vmem:[#allocation11_spill] sm:$0xff] %v1796_v11  ;;  %v704_v12 = vmax.f32 %v702_v3, %v1796_v11  ;;  %v1799_v13 = vpop.f32.mrb[30].mxu1 }
 0x291   : > { %v668_v16 = vmax.f32 %v666_v6, %v1799_v13  ;;  %v1802_v17 = vpop.f32.mrb[31].mxu1 }
 0x292   : > { %2769 = vst [vmem:[#allocation12_spill] sm:$0xff] %v1802_v17  ;;  %v705_v18 = vmax.f32 %v703_v8, %v1802_v17 }
 0x296   : > { %v1805_v19 = vpop.f32.mrb[32].mxu1 }
 0x297   : > { %v669_v25 = vmax.f32 %v667_v10, %v1805_v19  ;;  %v1808_v27 = vpop.f32.mrb[33].mxu1 }
 0x298   : > { %2770 = vst [vmem:[#allocation13_spill] sm:$0xff] %v1808_v27  ;;  %v706_v0 = vmax.f32 %v704_v12, %v1808_v27  ;;  %v1811_v30 = vpop.f32.mrb[34].mxu1 }
 0x299   : > { %v670_v32 = vmax.f32 %v668_v16, %v1811_v30  ;;  %v1814_v34 = vpop.f32.mrb[35].mxu1 }
 0x29a   : > { %2771 = vst [vmem:[#allocation14_spill] sm:$0xff] %v1814_v34  ;;  %v707_v36 = vmax.f32 %v705_v18, %v1814_v34 }
 0x29e   : > { %v1817_v38 = vpop.f32.mrb[36].mxu1 }
 0x29f   : > { %v671_v40 = vmax.f32 %v669_v25, %v1817_v38  ;;  %v1820_v42 = vpop.f32.mrb[37].mxu1 }
 0x2a0   : > { %2772 = vst [vmem:[#allocation15_spill] sm:$0xff] %v1820_v42  ;;  %v708_v44 = vmax.f32 %v706_v0, %v1820_v42  ;;  %v1823_v46 = vpop.f32.mrb[38].mxu1 }
 0x2a1   : > { %v672_v48 = vmax.f32 %v670_v32, %v1823_v46  ;;  %v1826_v50 = vpop.f32.mrb[39].mxu1 }
 0x2a2   : > { %2773 = vst [vmem:[#allocation16_spill] sm:$0xff] %v1826_v50  ;;  %v709_v52 = vmax.f32 %v707_v36, %v1826_v50 }
 0x2a6   : > { %v1829_v54 = vpop.f32.mrb[40].mxu1 }
 0x2a7   : > { %v673_v56 = vmax.f32 %v671_v40, %v1829_v54  ;;  %v1832_v58 = vpop.f32.mrb[41].mxu1 }
 0x2a8   : > { %2774 = vst [vmem:[#allocation17_spill] sm:$0xff] %v1832_v58  ;;  %v710_v60 = vmax.f32 %v708_v44, %v1832_v58  ;;  %v1835_v62 = vpop.f32.mrb[42].mxu1 }
 0x2a9   : > { %v674_v1 = vmax.f32 %v672_v48, %v1835_v62  ;;  %v1838_v3 = vpop.f32.mrb[43].mxu1 }
 0x2aa   : > { %2775 = vst [vmem:[#allocation18_spill] sm:$0xff] %v1838_v3  ;;  %v711_v6 = vmax.f32 %v709_v52, %v1838_v3 }
 0x2ae   : > { %v1841_v8 = vpop.f32.mrb[44].mxu1 }
 0x2af   : > { %v675_v10 = vmax.f32 %v673_v56, %v1841_v8  ;;  %v1844_v12 = vpop.f32.mrb[45].mxu1 }
 0x2b0   : > { %2776 = vst [vmem:[#allocation19_spill] sm:$0xff] %v1844_v12  ;;  %v712_v16 = vmax.f32 %v710_v60, %v1844_v12  ;;  %v1847_v18 = vpop.f32.mrb[46].mxu1 }
 0x2b1   : > { %v676_v25 = vmax.f32 %v674_v1, %v1847_v18  ;;  %v1850_v0 = vpop.f32.mrb[47].mxu1 }
 0x2b2   : > { %2777 = vst [vmem:[#allocation20_spill] sm:$0xff] %v1850_v0  ;;  %v713_v32 = vmax.f32 %v711_v6, %v1850_v0 }
 0x2b6   : > { %v1853_v36 = vpop.f32.mrb[48].mxu1 }
 0x2b7   : > { %v677_v40 = vmax.f32 %v675_v10, %v1853_v36  ;;  %v1856_v44 = vpop.f32.mrb[49].mxu1 }
 0x2b8   : > { %2778 = vst [vmem:[#allocation21_spill] sm:$0xff] %v1856_v44  ;;  %v714_v48 = vmax.f32 %v712_v16, %v1856_v44  ;;  %v1859_v52 = vpop.f32.mrb[50].mxu1 }
 0x2b9   : > { %v678_v56 = vmax.f32 %v676_v25, %v1859_v52  ;;  %v1862_v60 = vpop.f32.mrb[51].mxu1 }
 0x2ba   : > { %2779 = vst [vmem:[#allocation22_spill] sm:$0xff] %v1862_v60  ;;  %v715_v1 = vmax.f32 %v713_v32, %v1862_v60 }
 0x2be   : > { %v1865_v4 = vpop.f32.mrb[52].mxu1 }
 0x2bf   : > { %v679_v6 = vmax.f32 %v677_v40, %v1865_v4  ;;  %v1868_v14 = vpop.f32.mrb[53].mxu1 }
 0x2c0   : > { %2780 = vst [vmem:[#allocation23_spill] sm:$0xff] %v1868_v14  ;;  %v716_v10 = vmax.f32 %v714_v48, %v1868_v14  ;;  %v1871_v15 = vpop.f32.mrb[54].mxu1 }
 0x2c1   : > { %v680_v16 = vmax.f32 %v678_v56, %v1871_v15  ;;  %v1874_v44 = vpop.f32.mrb[55].mxu1 }
 0x2c2   : > { %2781 = vst [vmem:[#allocation24_spill] sm:$0xff] %v1874_v44  ;;  %v717_v25 = vmax.f32 %v715_v1, %v1874_v44 }
 0x2c6   : > { %v1877_v0 = vpop.f32.mrb[56].mxu1 }
 0x2c7   : > { %v681_v32 = vmax.f32 %v679_v6, %v1877_v0  ;;  %v1880_v60 = vpop.f32.mrb[57].mxu1 }
 0x2c8   : > { %2782 = vst [vmem:[#allocation25_spill] sm:$0xff] %v1880_v60  ;;  %v718_v40 = vmax.f32 %v716_v10, %v1880_v60  ;;  %v1883_v12 = vpop.f32.mrb[58].mxu1 }
 0x2c9   : > { %v682_v48 = vmax.f32 %v680_v16, %v1883_v12  ;;  %v1886_v14 = vpop.f32.mrb[59].mxu1 }
 0x2ca   : > { %2783 = vst [vmem:[#allocation26_spill] sm:$0xff] %v1886_v14  ;;  %v719_v56 = vmax.f32 %v717_v25, %v1886_v14 }
 0x2ce   : > { %v1889_v3 = vpop.f32.mrb[60].mxu1 }
 0x2cf   : > { %v683_v1 = vmax.f32 %v681_v32, %v1889_v3  ;;  %v1892_v44 = vpop.f32.mrb[61].mxu1 }
 0x2d0   : > { %2784 = vst [vmem:[#allocation27_spill] sm:$0xff] %v1892_v44  ;;  %v720_v6 = vmax.f32 %v718_v40, %v1892_v44  ;;  %v1895_v58 = vpop.f32.mrb[62].mxu1 }
 0x2d1   : > { %v684_v10 = vmax.f32 %v682_v48, %v1895_v58  ;;  %v1898_v60 = vpop.f32.mrb[63].mxu1 }
 0x2d2   : > { %2785 = vst [vmem:[#allocation28_spill] sm:$0xff] %v1898_v60  ;;  %v721_v16 = vmax.f32 %v719_v56, %v1898_v60 }
 0x2d3   : > { %v685_v50 = vmax.f32 %v683_v1, %v684_v10 }
 0x2d4   : > { %v722_v42 = vmax.f32 %v720_v6, %v721_v16 }
 0x2d5   : > { %v686_v34 = vrot.slane %v685_v50, 4 }
 0x2d6   : > { %v723_v25 = vrot.slane %v722_v42, 4 }
 0x2d7   : > { %v687_v14 = vmax.f32 %v685_v50, %v686_v34 }
 0x2d8   : > { %v724_v27 = vmax.f32 %v722_v42, %v723_v25 }
 0x2d9   : > { %v688_v17 = vrot.slane %v687_v14, 2 }
 0x2da   : > { %v725_v32 = vrot.slane %v724_v27, 2 }
 0x2db   : > { %v689_v11 = vmax.f32 %v687_v14, %v688_v17 }
 0x2dc   : > { %v726_v7 = vmax.f32 %v724_v27, %v725_v32 }
 0x2dd   : > { %v690_v2 = vrot.slane %v689_v11, 1 }
 0x2de   : > { %v727_v40 = vrot.slane %v726_v7, 1 }
 0x2df   : > { %v1901_v44 = vmax.f32 %v689_v11, %v690_v2 }
 0x2e0   : > { %v1903_v61 = vmax.f32 %v726_v7, %v727_v40 }
 0x2e1   : > { %v729_v48 = vsub.f32 %v1709_v20, %v1901_v44  ;;  %v731_v56 = vsub.f32 %v1713_v22, %v1901_v44  ;;  %v733_v34 = vsub.f32 %v1717_v24, %v1901_v44  ;;  %v735_v42 = vsub.f32 %v1725_v28, %v1901_v44 }
 0x2e2   : > { %v737_v14 = vsub.f32 %v1733_v31, %v1901_v44  ;;  %v739_v2 = vsub.f32 %v1739_v35, %v1901_v44  ;;  %v741_v7 = vsub.f32 %v1745_v39, %v1901_v44  ;;  %v743_v20 = vsub.f32 %v1751_v43, %v1901_v44  ;;  %v2808_v39 = vld [vmem:[#allocation24_spill] sm:$0xff] }
 0x2e3   : > { %v745_v22 = vsub.f32 %v1757_v47, %v1901_v44  ;;  %v747_v24 = vsub.f32 %v1763_v51, %v1901_v44  ;;  %v749_v28 = vsub.f32 %v1769_v55, %v1901_v44  ;;  %v751_v31 = vsub.f32 %v1775_v59, %v1901_v44  ;;  %v2801_v55 = vld [vmem:[#allocation19_spill] sm:$0xff]  ;;  %v2804_v47 = vld [vmem:[#allocation21_spill] sm:$0xff] }
 0x2e4   : > { %v793_v50 = vmul.f32 1.442695, %v729_v48  ;;  %v797_v16 = vmul.f32 1.442695, %v731_v56  ;;  %v801_v27 = vmul.f32 1.442695, %v733_v34  ;;  %v2813_v59 = vsub.f32 %v1793_v9, %v1901_v44 }
 0x2e5   : > { %v805_v40 = vmul.f32 1.442695, %v735_v42  ;;  %v809_v1 = vmul.f32 1.442695, %v737_v14  ;;  %v813_v17 = vmul.f32 1.442695, %v739_v2  ;;  %v2816_v9 = vsub.f32 %v1811_v30, %v1901_v44 }
 0x2e6   : > { %1359 = vpow2.f32 %v793_v50  ;;  %v817_v6 = vmul.f32 1.442695, %v741_v7  ;;  %v821_v11 = vmul.f32 1.442695, %v743_v20  ;;  %v825_v14 = vmul.f32 1.442695, %v745_v22 }
 0x2e7   : > { %1361 = vpow2.f32 %v797_v16  ;;  %v2788_v22 = vld [vmem:[#allocation8_spill] sm:$0xff]  ;;  %v2789_v7 = vld [vmem:[#allocation9_spill] sm:$0xff]  ;;  %v2790_v20 = vld [vmem:[#allocation10_spill] sm:$0xff]  ;;  %v833_v48 = vmul.f32 1.442695, %v749_v28 }
 0x2e8   : > { %1363 = vpow2.f32 %v801_v27  ;;  %v2792_v50 = vld [vmem:[#allocation11_spill] sm:$0xff]  ;;  %v2795_v2 = vld [vmem:[#allocation14_spill] sm:$0xff]  ;;  %v2799_v56 = vld [vmem:[#allocation17_spill] sm:$0xff]  ;;  %v849_v34 = vmul.f32 1.442695, %v2813_v59 }
 0x2e9   : > { %1365 = vpow2.f32 %v805_v40  ;;  %v829_v40 = vmul.f32 1.442695, %v747_v24  ;;  %v2794_v24 = vld [vmem:[#allocation13_spill] sm:$0xff]  ;;  %v2796_v42 = vld [vmem:[#allocation15_spill] sm:$0xff]  ;;  %v2800_v16 = vld [vmem:[#allocation18_spill] sm:$0xff] }
 0x2ea   : > { %1367 = vpow2.f32 %v809_v1  ;;  %v2793_v1 = vld [vmem:[#allocation12_spill] sm:$0xff]  ;;  %v2805_v28 = vld [vmem:[#allocation22_spill] sm:$0xff]  ;;  %v861_v59 = vmul.f32 1.442695, %v2816_v9 }
 0x2eb   : > { %1369 = vpow2.f32 %v813_v17 }
 0x2ec   : > { %1371 = vpow2.f32 %v817_v6 }
 0x2ed   : > { %1373 = vpow2.f32 %v821_v11  ;;  %v2798_v11 = vld [vmem:[#allocation16_spill] sm:$0xff] }
 0x2ee   : > { %1375 = vpow2.f32 %v825_v14 }
 0x2ef   : > { %1377 = vpow2.f32 %v829_v40  ;;  %v2809_v40 = vld [vmem:[#allocation25_spill] sm:$0xff] }
 0x2f0   : > { %v1981_v27 = vpop.eup %1359  ;;  %1379 = vpow2.f32 %v833_v48 }
 0x2f1   : > { %2786 = vst [vmem:[#allocation29_spill] sm:$0xff] %v1981_v27  ;;  %v1989_v17 = vpop.eup %1361 }
 0x2f2   : > { %2787 = vst [vmem:[#allocation30_spill] sm:$0xff] %v1989_v17  ;;  %v921_v10 = vadd.f32 %v1989_v17, %v1981_v27  ;;  %v2003_v6 = vpop.eup %1363  ;;  %v2812_v27 = vsub.f32 %v1787_v5, %v1901_v44  ;;  %v2815_v5 = vsub.f32 %v1805_v19, %v1901_v44  ;;  %v2818_v19 = vsub.f32 %v1715_v23, %v1903_v61 }
 0x2f3   : > { %2791 = vst [vmem:[#allocation8_spill] sm:$0xff] %v2003_v6  ;;  %v2016_v51 = vpop.eup %1365 }
 0x2f4   : > { %v922_v32 = vadd.f32 %v2003_v6, %v921_v10  ;;  %2797 = vst [vmem:[#allocation9_spill] sm:$0xff] %v2016_v51  ;;  %v837_v10 = vmul.f32 1.442695, %v751_v31  ;;  %v2032_v35 = vpop.eup %1367  ;;  %v2810_v6 = vld [vmem:[#allocation26_spill] sm:$0xff]  ;;  %v2811_v31 = vld [vmem:[#allocation27_spill] sm:$0xff] }
 0x2f5   : > { %2803 = vst [vmem:[#allocation10_spill] sm:$0xff] %v2032_v35  ;;  %v2048_v14 = vpop.eup %1369  ;;  %v845_v17 = vmul.f32 1.442695, %v2812_v27  ;;  %v857_v27 = vmul.f32 1.442695, %v2815_v5 }
 0x2f6   : > { %v923_v25 = vadd.f32 %v2016_v51, %v922_v32  ;;  %v2807_v32 = vsub.f32 %v1781_v63, %v1901_v44  ;;  %1381 = vpow2.f32 %v837_v10 }
 0x2f8   : > { %v841_v51 = vmul.f32 1.442695, %v2807_v32  ;;  %v924_v43 = vadd.f32 %v2032_v35, %v923_v25  ;;  %v2057_v32 = vpop.eup %1371 }
 0x2f9   : > { %v2063_v35 = vpop.eup %1373 }
 0x2fa   : > { %v925_v25 = vadd.f32 %v2048_v14, %v924_v43  ;;  %1383 = vpow2.f32 %v841_v51  ;;  %v2069_v60 = vpop.eup %1375  ;;  %v2814_v43 = vsub.f32 %v1799_v13, %v1901_v44 }
 0x2fb   : > { %1385 = vpow2.f32 %v845_v17  ;;  %v2078_v51 = vpop.eup %1377  ;;  %v2817_v17 = vsub.f32 %v1711_v21, %v1903_v61  ;;  %v2820_v21 = vsub.f32 %v1721_v26, %v1903_v61 }
 0x2fc   : > { %v926_v48 = vadd.f32 %v2057_v32, %v925_v25  ;;  %v853_v10 = vmul.f32 1.442695, %v2814_v43  ;;  %1387 = vpow2.f32 %v849_v34  ;;  %v2087_v43 = vpop.eup %1379  ;;  %v2819_v34 = vsub.f32 %v1817_v38, %v1901_v44 }
 0x2fd   : > { %v795_v13 = vmul.f32 1.442695, %v2817_v17  ;;  %v2823_v38 = vsub.f32 %v1729_v29, %v1903_v61 }
 0x2fe   : > { %v927_v63 = vadd.f32 %v2063_v35, %v926_v48  ;;  %1389 = vpow2.f32 %v853_v10  ;;  %v865_v5 = vmul.f32 1.442695, %v2819_v34  ;;  %v2821_v10 = vsub.f32 %v1823_v46, %v1901_v44 }
 0x2ff   : > { %1391 = vpow2.f32 %v857_v27  ;;  %v2826_v46 = vsub.f32 %v1736_v33, %v1903_v61 }
 0x300   : > { %v928_v25 = vadd.f32 %v2069_v60, %v927_v63  ;;  %v799_v63 = vmul.f32 1.442695, %v2818_v19  ;;  %v2096_v9 = vpop.eup %1381  ;;  %1393 = vpow2.f32 %v861_v59  ;;  %v869_v17 = vmul.f32 1.442695, %v2821_v10 }
 0x301   : > { %1395 = vpow2.f32 %v795_v13  ;;  %v2824_v59 = vsub.f32 %v1829_v54, %v1901_v44  ;;  %v811_v13 = vmul.f32 1.442695, %v2826_v46  ;;  %v2828_v54 = vsub.f32 %v1742_v37, %v1903_v61 }
 0x302   : > { %v929_v48 = vadd.f32 %v2078_v51, %v928_v25  ;;  %v803_v25 = vmul.f32 1.442695, %v2820_v21  ;;  %1397 = vpow2.f32 %v799_v63  ;;  %v2827_v63 = vsub.f32 %v1835_v62, %v1901_v44 }
 0x303   : > { %1399 = vpow2.f32 %v865_v5  ;;  %v873_v26 = vmul.f32 1.442695, %v2824_v59  ;;  %v815_v21 = vmul.f32 1.442695, %v2828_v54  ;;  %v2830_v62 = vsub.f32 %v1748_v41, %v1903_v61 }
 0x304   : > { %v930_v30 = vadd.f32 %v2087_v43, %v929_v48  ;;  %v2105_v27 = vpop.eup %1383  ;;  %v807_v48 = vmul.f32 1.442695, %v2823_v38  ;;  %1401 = vpow2.f32 %v803_v25  ;;  %v877_v29 = vmul.f32 1.442695, %v2827_v63 }
 0x305   : > { %2822 = vst [vmem:[#allocation11_spill] sm:$0xff] %v2105_v27  ;;  %v2114_v34 = vpop.eup %1385  ;;  %1403 = vpow2.f32 %v869_v17  ;;  %v2829_v25 = vsub.f32 %v1841_v8, %v1901_v44  ;;  %v2831_v37 = vsub.f32 %v1847_v18, %v1901_v44  ;;  %v2833_v41 = vsub.f32 %v1853_v36, %v1901_v44 }
 0x306   : > { %v931_v23 = vadd.f32 %v2096_v9, %v930_v30  ;;  %2825 = vst [vmem:[#allocation12_spill] sm:$0xff] %v2114_v34  ;;  %v2123_v30 = vpop.eup %1387  ;;  %1405 = vpow2.f32 %v807_v48 }
 0x307   : > { %1407 = vpow2.f32 %v873_v26  ;;  %v881_v33 = vmul.f32 1.442695, %v2829_v25  ;;  %v885_v48 = vmul.f32 1.442695, %v2831_v37  ;;  %v2832_v26 = vsub.f32 %v1754_v45, %v1903_v61 }
 0x308   : > { %v932_v19 = vadd.f32 %v2105_v27, %v931_v23  ;;  %v2132_v17 = vpop.eup %1389  ;;  %1409 = vpow2.f32 %v811_v13  ;;  %v819_v23 = vmul.f32 1.442695, %v2830_v62  ;;  %v889_v13 = vmul.f32 1.442695, %v2833_v41 }
 0x309   : > { %v2137_v38 = vpop.eup %1391  ;;  %1411 = vpow2.f32 %v877_v29  ;;  %v2834_v29 = vsub.f32 %v1760_v49, %v1903_v61  ;;  %v2835_v45 = vsub.f32 %v1859_v52, %v1901_v44  ;;  %v2839_v41 = vsub.f32 %v1871_v15, %v1901_v44 }
 0x30a   : > { %v933_v5 = vadd.f32 %v2114_v34, %v932_v19  ;;  %v2143_v8 = vpop.eup %1393  ;;  %1413 = vpow2.f32 %v815_v21  ;;  %v823_v19 = vmul.f32 1.442695, %v2832_v26  ;;  %v2838_v26 = vsub.f32 %v1772_v57, %v1903_v61 }
 0x30b   : > { %v2148_v46 = vpop.eup %1395  ;;  %1415 = vpow2.f32 %v881_v33  ;;  %v893_v21 = vmul.f32 1.442695, %v2835_v45 }
 0x30c   : > { %v934_v10 = vadd.f32 %v2123_v30, %v933_v5  ;;  %v2154_v18 = vpop.eup %1397  ;;  %1417 = vpow2.f32 %v819_v23  ;;  %v827_v5 = vmul.f32 1.442695, %v2834_v29  ;;  %v2837_v23 = vsub.f32 %v1865_v4, %v1901_v44 }
 0x30d   : > { %v2159_v54 = vpop.eup %1399  ;;  %1419 = vpow2.f32 %v885_v48  ;;  %v958_v36 = vadd.f32 %v2154_v18, %v2148_v46 }
 0x30e   : > { %v935_v59 = vadd.f32 %v2132_v17, %v934_v10  ;;  %v2167_v33 = vpop.eup %1401  ;;  %1421 = vpow2.f32 %v823_v19  ;;  %v2836_v10 = vsub.f32 %v1766_v53, %v1903_v61  ;;  %v897_v52 = vmul.f32 1.442695, %v2837_v23 }
 0x30f   : > { %v2172_v62 = vpop.eup %1403  ;;  %1423 = vpow2.f32 %v889_v13  ;;  %v959_v48 = vadd.f32 %v2167_v33, %v958_v36  ;;  %v835_v19 = vmul.f32 1.442695, %v2838_v26  ;;  %v901_v13 = vmul.f32 1.442695, %v2839_v41 }
 0x310   : > { %v936_v63 = vadd.f32 %v2137_v38, %v935_v59  ;;  %v831_v49 = vmul.f32 1.442695, %v2836_v10  ;;  %v2179_v59 = vpop.eup %1405  ;;  %1425 = vpow2.f32 %v827_v5  ;;  %v2840_v5 = vsub.f32 %v2788_v22, %v1903_v61 }
 0x311   : > { %v2184_v53 = vpop.eup %1407  ;;  %1427 = vpow2.f32 %v893_v21  ;;  %v2841_v21 = vsub.f32 %v1877_v0, %v1901_v44 }
 0x312   : > { %v937_v25 = vadd.f32 %v2143_v8, %v936_v63  ;;  %v960_v63 = vadd.f32 %v2179_v59, %v959_v48  ;;  %v2191_v29 = vpop.eup %1409  ;;  %1429 = vpow2.f32 %v831_v49  ;;  %v839_v45 = vmul.f32 1.442695, %v2840_v5 }
 0x313   : > { %v2196_v57 = vpop.eup %1411  ;;  %1431 = vpow2.f32 %v897_v52  ;;  %v2842_v49 = vsub.f32 %v2789_v7, %v1903_v61  ;;  %v2843_v52 = vsub.f32 %v1883_v12, %v1901_v44 }
 0x314   : > { %v938_v37 = vadd.f32 %v2159_v54, %v937_v25  ;;  %v905_v25 = vmul.f32 1.442695, %v2841_v21  ;;  %v961_v36 = vadd.f32 %v2191_v29, %v960_v63  ;;  %v2203_v10 = vpop.eup %1413  ;;  %1433 = vpow2.f32 %v835_v19 }
 0x315   : > { %v843_v23 = vmul.f32 1.442695, %v2842_v49  ;;  %v2208_v22 = vpop.eup %1415  ;;  %1435 = vpow2.f32 %v901_v13  ;;  %v2844_v19 = vsub.f32 %v2790_v20, %v1903_v61  ;;  %v2845_v13 = vsub.f32 %v1889_v3, %v1901_v44 }
 0x316   : > { %v939_v4 = vadd.f32 %v2172_v62, %v938_v37  ;;  %v909_v37 = vmul.f32 1.442695, %v2843_v52  ;;  %v962_v48 = vadd.f32 %v2203_v10, %v961_v36  ;;  %v2215_v26 = vpop.eup %1417  ;;  %1437 = vpow2.f32 %v839_v45 }
 0x317   : > { %v847_v41 = vmul.f32 1.442695, %v2844_v19  ;;  %v2220_v7 = vpop.eup %1419  ;;  %1439 = vpow2.f32 %v905_v25  ;;  %v2846_v45 = vsub.f32 %v2792_v50, %v1903_v61  ;;  %v2847_v25 = vsub.f32 %v1895_v58, %v1901_v44 }
 0x318   : > { %v940_v15 = vadd.f32 %v2184_v53, %v939_v4  ;;  %v913_v4 = vmul.f32 1.442695, %v2845_v13  ;;  %v963_v63 = vadd.f32 %v2215_v26, %v962_v48  ;;  %v2227_v5 = vpop.eup %1421  ;;  %1441 = vpow2.f32 %v843_v23 }
 0x319   : > { %v851_v21 = vmul.f32 1.442695, %v2846_v45  ;;  %v2232_v20 = vpop.eup %1423  ;;  %1443 = vpow2.f32 %v909_v37  ;;  %v2848_v23 = vsub.f32 %v2793_v1, %v1903_v61  ;;  %v2849_v44 = vsub.f32 %v2794_v24, %v1903_v61 }
 0x31a   : > { %v941_v0 = vadd.f32 %v2196_v57, %v940_v15  ;;  %v917_v15 = vmul.f32 1.442695, %v2847_v25  ;;  %v964_v36 = vadd.f32 %v2227_v5, %v963_v63  ;;  %v2239_v49 = vpop.eup %1425  ;;  %1445 = vpow2.f32 %v847_v41 }
 0x31b   : > { %v855_v52 = vmul.f32 1.442695, %v2848_v23  ;;  %v2244_v50 = vpop.eup %1427  ;;  %1447 = vpow2.f32 %v913_v4  ;;  %v859_v48 = vmul.f32 1.442695, %v2849_v44  ;;  %v2850_v4 = vsub.f32 %v2795_v2, %v1903_v61 }
 0x31c   : > { %v942_v12 = vadd.f32 %v2208_v22, %v941_v0  ;;  %v965_v0 = vadd.f32 %v2239_v49, %v964_v36  ;;  %v2248_v58 = vpop.eup %1429  ;;  %1449 = vpow2.f32 %v851_v21  ;;  %v2851_v25 = vsub.f32 %v2796_v42, %v1903_v61 }
 0x31d   : > { %v2253_v19 = vpop.eup %1431  ;;  %1451 = vpow2.f32 %v917_v15 }
 0x31e   : > { %v943_v3 = vadd.f32 %v2220_v7, %v942_v12  ;;  %v966_v41 = vadd.f32 %v2248_v58, %v965_v0  ;;  %v2257_v13 = vpop.eup %1433  ;;  %1453 = vpow2.f32 %v855_v52  ;;  %v863_v12 = vmul.f32 1.442695, %v2850_v4 }
 0x31f   : > { %v2262_v63 = vpop.eup %1435  ;;  %1455 = vpow2.f32 %v859_v48  ;;  %v867_v15 = vmul.f32 1.442695, %v2851_v25  ;;  %v2853_v52 = vsub.f32 %v2798_v11, %v1903_v61 }
 0x320   : > { %v944_v37 = vadd.f32 %v2232_v20, %v943_v3  ;;  %v967_v24 = vadd.f32 %v2257_v13, %v966_v41  ;;  %v2266_v21 = vpop.eup %1437  ;;  %1457 = vpow2.f32 %v863_v12 }
 0x321   : > { %v2271_v3 = vpop.eup %1439  ;;  %1459 = vpow2.f32 %v867_v15 }
 0x322   : > { %v945_v1 = vadd.f32 %v2244_v50, %v944_v37  ;;  %v968_v2 = vadd.f32 %v2266_v21, %v967_v24  ;;  %v2275_v23 = vpop.eup %1441  ;;  %v871_v37 = vmul.f32 1.442695, %v2853_v52  ;;  %v2856_v24 = vsub.f32 %v2800_v16, %v1903_v61  ;;  %v2858_v16 = vld [vmem:[#allocation20_spill] sm:$0xff] }
 0x323   : > { %2852 = vst [vmem:[#allocation13_spill] sm:$0xff] %v2275_v23  ;;  %v2280_v0 = vpop.eup %1443  ;;  %v2857_v52 = vsub.f32 %v2801_v55, %v1903_v61  ;;  %v2860_v55 = vsub.f32 %v2804_v47, %v1903_v61 }
 0x324   : > { %v946_v45 = vadd.f32 %v2253_v19, %v945_v1  ;;  %v969_v42 = vadd.f32 %v2275_v23, %v968_v2  ;;  %v2284_v48 = vpop.eup %1445  ;;  %v2855_v1 = vsub.f32 %v2799_v56, %v1903_v61  ;;  %1461 = vpow2.f32 %v871_v37 }
 0x325   : > { %2854 = vst [vmem:[#allocation14_spill] sm:$0xff] %v2284_v48  ;;  %v2289_v4 = vpop.eup %1447  ;;  %v879_v25 = vmul.f32 1.442695, %v2856_v24  ;;  %v2859_v24 = vsub.f32 %v2858_v16, %v1903_v61 }
 0x326   : > { %v947_v36 = vadd.f32 %v2262_v63, %v946_v45  ;;  %v875_v41 = vmul.f32 1.442695, %v2855_v1  ;;  %v970_v11 = vadd.f32 %v2284_v48, %v969_v42  ;;  %v2293_v45 = vpop.eup %1449 }
 0x328   : > { %v948_v44 = vadd.f32 %v2271_v3, %v947_v36  ;;  %v2298_v36 = vpop.eup %1451  ;;  %v971_v56 = vadd.f32 %v2293_v45, %v970_v11  ;;  %1463 = vpow2.f32 %v875_v41  ;;  %v891_v41 = vmul.f32 1.442695, %v2860_v55 }
 0x329   : > { %v2302_v2 = vpop.eup %1453  ;;  %1465 = vpow2.f32 %v879_v25  ;;  %v2861_v25 = vsub.f32 %v2805_v28, %v1903_v61  ;;  %v2864_v28 = vsub.f32 %v2808_v39, %v1903_v61 }
 0x32a   : > { %v949_v12 = vadd.f32 %v2280_v0, %v948_v44  ;;  %v883_v44 = vmul.f32 1.442695, %v2857_v52  ;;  %v972_v37 = vadd.f32 %v2302_v2, %v971_v56  ;;  %v2309_v1 = vpop.eup %1455 }
 0x32b   : > { %v2315_v27 = vpop.eup %1457  ;;  %v895_v16 = vmul.f32 1.442695, %v2861_v25 }
 0x32c   : > { %v950_v15 = vadd.f32 %v2289_v4, %v949_v12  ;;  %v887_v12 = vmul.f32 1.442695, %v2859_v24  ;;  %v973_v11 = vadd.f32 %v2309_v1, %v972_v37  ;;  %1467 = vpow2.f32 %v883_v44  ;;  %v2321_v52 = vpop.eup %1459  ;;  %v2862_v44 = vld [vmem:[#allocation23_spill] sm:$0xff] }
 0x32d   : > { %v2863_v47 = vsub.f32 %v2862_v44, %v1903_v61 }
 0x32e   : > { %v951_v42 = vadd.f32 %v2298_v36, %v950_v15  ;;  %v974_v56 = vadd.f32 %v2315_v27, %v973_v11  ;;  %1469 = vpow2.f32 %v887_v12  ;;  %v2327_v48 = vpop.eup %1461  ;;  %v903_v12 = vmul.f32 1.442695, %v2864_v28 }
 0x32f   : > { %1471 = vpow2.f32 %v891_v41  ;;  %v899_v55 = vmul.f32 1.442695, %v2863_v47  ;;  %v2865_v41 = vsub.f32 %v2809_v40, %v1903_v61 }
 0x330   : > { %v952_v34 = vrot.slane %v951_v42, 4  ;;  %v975_v37 = vadd.f32 %v2321_v52, %v974_v56  ;;  %1473 = vpow2.f32 %v895_v16 }
 0x331   : > { %1475 = vpow2.f32 %v899_v55  ;;  %v907_v44 = vmul.f32 1.442695, %v2865_v41  ;;  %v2867_v55 = vsub.f32 %v2811_v31, %v1903_v61 }
 0x332   : > { %v953_v15 = vadd.f32 %v952_v34, %v951_v42  ;;  %v976_v42 = vadd.f32 %v2327_v48, %v975_v37  ;;  %v2333_v11 = vpop.eup %1463  ;;  %1477 = vpow2.f32 %v903_v12 }
 0x333   : > { %v2339_v23 = vpop.eup %1465  ;;  %1479 = vpow2.f32 %v907_v44  ;;  %v915_v40 = vmul.f32 1.442695, %v2867_v55 }
 0x334   : > { %v954_v24 = vrot.slane %v953_v15, 2  ;;  %v977_v56 = vadd.f32 %v2333_v11, %v976_v42 }
 0x336   : > { %v955_v34 = vadd.f32 %v954_v24, %v953_v15  ;;  %v2866_v15 = vsub.f32 %v2810_v6, %v1903_v61  ;;  %v978_v16 = vadd.f32 %v2339_v23, %v977_v56  ;;  %v2348_v37 = vpop.eup %1467  ;;  %v2868_v56 = vld [vmem:[#allocation28_spill] sm:$0xff] }
 0x337   : > { %v2869_v41 = vsub.f32 %v2868_v56, %v1903_v61 }
 0x338   : > { %v956_v25 = vrot.slane %v955_v34, 1  ;;  %v911_v24 = vmul.f32 1.442695, %v2866_v15  ;;  %v979_v47 = vadd.f32 %v2348_v37, %v978_v16  ;;  %v2351_v42 = vpop.eup %1469 }
 0x339   : > { %v2357_v6 = vpop.eup %1471 }
 0x33a   : > { %v957_v39 = vadd.f32 %v956_v25, %v955_v34  ;;  %1481 = vpow2.f32 %v911_v24  ;;  %v980_v28 = vadd.f32 %v2351_v42, %v979_v47  ;;  %v919_v34 = vmul.f32 1.442695, %v2869_v41  ;;  %v2363_v25 = vpop.eup %1473 }
 0x33b   : > { %v2366_v15 = vpop.eup %1475 }
 0x33c   : > { %1483 = vrcp.f32 %v957_v39  ;;  %v981_v12 = vadd.f32 %v2357_v6, %v980_v28  ;;  %v2369_v24 = vpop.eup %1477 }
 0x33d   : > { %1485 = vpow2.f32 %v915_v40  ;;  %v2372_v39 = vpop.eup %1479 }
 0x33e   : > { %v982_v44 = vadd.f32 %v2363_v25, %v981_v12  ;;  %1487 = vpow2.f32 %v919_v34 }
 0x340   : > { %v983_v31 = vadd.f32 %v2366_v15, %v982_v44 }
 0x342   : > { %v984_v16 = vadd.f32 %v2369_v24, %v983_v31 }
 0x344   : > { %v2374_v61 = vpop.eup %1481  ;;  %v985_v47 = vadd.f32 %v2372_v39, %v984_v16 }
 0x346   : > { %v2377_v55 = vpop.eup %1483  ;;  %v986_v40 = vadd.f32 %v2374_v61, %v985_v47 }
 0x347   : > { %v2380_v28 = vpop.eup %1485  ;;  %v2385_v41 = vmul.f32 %v2377_v55, %v2123_v30  ;;  %v2389_v34 = vmul.f32 %v2377_v55, %v2132_v17  ;;  %v2395_v44 = vmul.f32 %v2377_v55, %v2137_v38  ;;  %v2399_v31 = vmul.f32 %v2377_v55, %v2143_v8 }
 0x348   : > { %v987_v56 = vadd.f32 %v2380_v28, %v986_v40  ;;  %v2391_v12 = vpop.eup %1487  ;;  %v2406_v47 = vmul.f32 %v2377_v55, %v2159_v54  ;;  %v2410_v17 = vmul.f32 %v2377_v55, %v2172_v62  ;;  %v2416_v8 = vmul.f32 %v2377_v55, %v2184_v53 }
 0x349   : > { %v2420_v40 = vmul.f32 %v2377_v55, %v2196_v57  ;;  %v2430_v30 = vmul.f32 %v2377_v55, %v2220_v7  ;;  %v2434_v53 = vmul.f32 %v2377_v55, %v2232_v20  ;;  %v2440_v38 = vmul.f32 %v2377_v55, %v2244_v50 }
 0x34a   : > { %v988_v16 = vadd.f32 %v2391_v12, %v987_v56  ;;  %2870 = vst [vmem:[#allocation15_spill] sm:$0xff] %v2406_v47  ;;  %v2424_v56 = vmul.f32 %v2377_v55, %v2208_v22  ;;  %v2444_v22 = vmul.f32 %v2377_v55, %v2253_v19  ;;  %v2448_v62 = vmul.f32 %v2377_v55, %v2262_v63 }
 0x34b   : > { %2871 = vst [vmem:[#allocation16_spill] sm:$0xff] %v2434_v53  ;;  %2872 = vst [vmem:[#allocation17_spill] sm:$0xff] %v2440_v38  ;;  %v2454_v47 = vmul.f32 %v2377_v55, %v2271_v3  ;;  %v2458_v50 = vmul.f32 %v2377_v55, %v2280_v0  ;;  %v2466_v63 = vmul.f32 %v2377_v55, %v2289_v4 }
 0x34c   : > { %v989_v54 = vrot.slane %v988_v16, 4  ;;  %2873 = vst [vmem:[#allocation18_spill] sm:$0xff] %v2444_v22  ;;  %2874 = vst [vmem:[#allocation19_spill] sm:$0xff] %v2448_v62  ;;  %v2876_v22 = vld [vmem:[#allocation29_spill] sm:$0xff]  ;;  %v2877_v62 = vld [vmem:[#allocation30_spill] sm:$0xff] }
 0x34d   : > { %2875 = vst [vmem:[#allocation21_spill] sm:$0xff] %v2466_v63  ;;  %v997_v4 = vmul.f32 %v2377_v55, %v2876_v22  ;;  %v2878_v22 = vld [vmem:[#allocation8_spill] sm:$0xff] }
 0x34e   : > { %v990_v7 = vadd.f32 %v989_v54, %v988_v16  ;;  %v2470_v16 = vmul.f32 %v2377_v55, %v2298_v36  ;;  %v999_v36 = vmul.f32 %v2377_v55, %v2877_v62  ;;  %v1001_v0 = vmul.f32 %v2377_v55, %v2878_v22  ;;  %v2879_v62 = vld [vmem:[#allocation9_spill] sm:$0xff] }
 0x34f   : > { %v1003_v63 = vmul.f32 %v2377_v55, %v2879_v62  ;;  %v2880_v62 = vld [vmem:[#allocation10_spill] sm:$0xff] }
 0x350   : > { %v991_v3 = vrot.slane %v990_v7, 2 }
 0x352   : > { %v992_v20 = vadd.f32 %v991_v3, %v990_v7 }
 0x354   : > { %v993_v19 = vrot.slane %v992_v20, 1 }
 0x356   : > { %v994_v53 = vadd.f32 %v993_v19, %v992_v20  ;;  %v1063_v19 = vpack.c.bf16 %v999_v36, %v997_v4 }
 0x358   : > { %1489 = vrcp.f32 %v994_v53 }
 0x362   : > { %v2476_v57 = vpop.eup %1489 }
 0x363   : > { %v998_v38 = vmul.f32 %v2476_v57, %v2148_v46  ;;  %v1000_v54 = vmul.f32 %v2476_v57, %v2154_v18  ;;  %v1002_v7 = vmul.f32 %v2476_v57, %v2167_v33  ;;  %v1004_v53 = vmul.f32 %v2476_v57, %v2179_v59 }
 0x364   : > { %v2496_v46 = vmul.f32 %v2476_v57, %v2293_v45  ;;  %v1006_v18 = vmul.f32 %v2476_v57, %v2191_v29  ;;  %v2502_v33 = vmul.f32 %v2476_v57, %v2302_v2  ;;  %v2506_v59 = vmul.f32 %v2476_v57, %v2309_v1 }
 0x365   : > { %v1064_v20 = vpack.c.bf16 %v1000_v54, %v998_v38  ;;  %v1066_v3 = vpack.c.bf16 %v1004_v53, %v1002_v7  ;;  %v2510_v38 = vmul.f32 %v2476_v57, %v2315_v27  ;;  %v1008_v45 = vmul.f32 %v2476_v57, %v2203_v10 }
 0x366   : > { %v2516_v54 = vmul.f32 %v2476_v57, %v2321_v52  ;;  %v2520_v29 = vmul.f32 %v2476_v57, %v2327_v48  ;;  %v2524_v2 = vmul.f32 %v2476_v57, %v2333_v11  ;;  %v1078_v27 = vpack.c.bf16 %v2502_v33, %v2496_v46 }
 0x367   : > { %1095 = vmatprep.subr.bf16.mxu0 %v1064_v20  ;;  %v1080_v1 = vpack.c.bf16 %v2510_v38, %v2506_v59  ;;  %v2532_v10 = vmul.f32 %v2476_v57, %v2339_v23  ;;  %v2536_v52 = vmul.f32 %v2476_v57, %v2348_v37  ;;  %v2542_v11 = vmul.f32 %v2476_v57, %v2351_v42 }
 0x368   : > { %1096 = vmatpush1.bf16.xpose.msra.mxu0 %v1063_v19  ;;  %v1082_v48 = vpack.c.bf16 %v2520_v29, %v2516_v54  ;;  %v2546_v4 = vmul.f32 %v2476_v57, %v2357_v6  ;;  %v2550_v36 = vmul.f32 %v2476_v57, %v2363_v25  ;;  %v2556_v37 = vmul.f32 %v2476_v57, %v2366_v15 }
 0x369   : > { %1097 = vmatprep.subr.bf16.mxu0 %v1066_v3  ;;  %v1084_v23 = vpack.c.bf16 %v2532_v10, %v2524_v2  ;;  %v1052_v7 = vmul.f32 %v2476_v57, %v2369_v24  ;;  %v2562_v42 = vmul.f32 %v2476_v57, %v2372_v39  ;;  %v1086_v6 = vpack.c.bf16 %v2542_v11, %v2536_v52 }
 0x36a   : > { %v1088_v25 = vpack.c.bf16 %v2550_v36, %v2546_v4  ;;  %v1056_v53 = vmul.f32 %v2476_v57, %v2374_v61  ;;  %v1058_v15 = vmul.f32 %v2476_v57, %v2380_v28  ;;  %v1065_v20 = vpack.c.bf16 %v1003_v63, %v1001_v0  ;;  %v2884_v4 = vld [vmem:[#allocation12_spill] sm:$0xff] }
 0x36b   : > { %v1090_v19 = vpack.c.bf16 %v1052_v7, %v2556_v37  ;;  %v1060_v24 = vmul.f32 %v2476_v57, %v2391_v12  ;;  %v1068_v39 = vpack.c.bf16 %v1008_v45, %v1006_v18  ;;  %v1005_v46 = vmul.f32 %v2377_v55, %v2880_v62  ;;  %v2887_v37 = vld [vmem:[#allocation15_spill] sm:$0xff] }
 0x36c   : > { %v1092_v3 = vpack.c.bf16 %v1056_v53, %v2562_v42  ;;  %v1007_v61 = vmul.f32 %v2377_v55, %v2048_v14  ;;  %v1010_v28 = vmul.f32 %v2476_v57, %v2215_v26  ;;  %v1012_v63 = vmul.f32 %v2476_v57, %v2227_v5 }
 0x36d   : > { %v1094_v22 = vpack.c.bf16 %v1060_v24, %v1058_v15  ;;  %v1009_v18 = vmul.f32 %v2377_v55, %v2057_v32  ;;  %v1011_v33 = vmul.f32 %v2377_v55, %v2063_v35  ;;  %v1014_v59 = vmul.f32 %v2476_v57, %v2239_v49 }
 0x36e   : > { %v1067_v0 = vpack.c.bf16 %v1007_v61, %v1005_v46  ;;  %v1070_v12 = vpack.c.bf16 %v1012_v63, %v1010_v28  ;;  %v1016_v14 = vmul.f32 %v2476_v57, %v2248_v58  ;;  %v1013_v5 = vmul.f32 %v2377_v55, %v2069_v60  ;;  %v2881_v60 = vld [vmem:[#allocation13_spill] sm:$0xff]  ;;  %v1491_v46 = vld [vmem:[%s1650_s13] sm:$0xff]  ;;  %s1203_s13 = scalar_lea.sflag [#allocation3], %s215_s8 }
 0x36f   : > { %v1069_v26 = vpack.c.bf16 %v1011_v33, %v1009_v18  ;;  %v1015_v45 = vmul.f32 %v2377_v55, %v2078_v51  ;;  %v1018_v32 = vmul.f32 %v2476_v57, %v2257_v13  ;;  %v1020_v35 = vmul.f32 %v2476_v57, %v2266_v21  ;;  %v2882_v51 = vld [vmem:[#allocation14_spill] sm:$0xff]  ;;  %v2883_v21 = vld [vmem:[#allocation11_spill] sm:$0xff]  ;;  %v2902_v63 = vld [vmem:[#allocation5_spill] sm:$0xff] }
 0x370   : > { %1098 = vmatpush1.bf16.xpose.msra.mxu0 %v1065_v20  ;;  %v1072_v38 = vpack.c.bf16 %v1016_v14, %v1014_v59  ;;  %v1017_v58 = vmul.f32 %v2377_v55, %v2087_v43  ;;  %v1019_v29 = vmul.f32 %v2377_v55, %v2096_v9  ;;  %v1022_v2 = vmul.f32 %v2476_v57, %v2881_v60 }
 0x371   : > { %1099 = vmatprep.subr.bf16.mxu0 %v1068_v39  ;;  %v1071_v49 = vpack.c.bf16 %v1015_v45, %v1013_v5  ;;  %v1074_v54 = vpack.c.bf16 %v1020_v35, %v1018_v32  ;;  %v1024_v10 = vmul.f32 %v2476_v57, %v2882_v51  ;;  %v1021_v11 = vmul.f32 %v2377_v55, %v2883_v21 }
 0x372   : > { %v1073_v13 = vpack.c.bf16 %v1019_v29, %v1017_v58  ;;  %v1023_v36 = vmul.f32 %v2377_v55, %v2884_v4  ;;  %v2885_v9 = vpack.c.bf16 %v2389_v34, %v2385_v41  ;;  %v2886_v57 = vpack.c.bf16 %v2399_v31, %v2395_v44  ;;  %v2891_v34 = vld [vmem:[#allocation17_spill] sm:$0xff]  ;;  %v2894_v31 = vld [vmem:[#allocation19_spill] sm:$0xff] }
 0x373   : > { %v1076_v52 = vpack.c.bf16 %v1024_v10, %v1022_v2  ;;  %v2888_v7 = vpack.c.bf16 %v2410_v17, %v2887_v37  ;;  %v2889_v55 = vpack.c.bf16 %v2420_v40, %v2416_v8  ;;  %v2890_v41 = vpack.c.bf16 %v2430_v30, %v2424_v56  ;;  %v2898_v40 = vld [vmem:[#allocation21_spill] sm:$0xff]  ;;  %v2900_v56 = vld [vmem:[#allocation7_spill] sm:$0xff] }
 0x374   : > { %v1075_v43 = vpack.c.bf16 %v1023_v36, %v1021_v11  ;;  %v2897_v8 = vpack.c.bf16 %v2458_v50, %v2454_v47  ;;  %v2899_v30 = vpack.c.bf16 %v2470_v16, %v2898_v40  ;;  %v1136_v16 = vld [vmem:[%s2699_s3] sm:$0x3] }
 0x378   : > { %1100 = vmatpush1.bf16.xpose.msra.mxu0 %v1067_v0 }
 0x379   : > { %1101 = vmatprep.subr.bf16.mxu0 %v1070_v12 }
 0x380   : > { %1102 = vmatpush1.bf16.xpose.msra.mxu0 %v1069_v26 }
 0x381   : > { %1103 = vmatprep.subr.bf16.mxu0 %v1072_v38 }
 0x388   : > { %1104 = vmatpush1.bf16.xpose.msra.mxu0 %v1071_v49 }
 0x389   : > { %1105 = vmatprep.subr.bf16.mxu0 %v1074_v54 }
 0x390   : > { %1106 = vmatpush1.bf16.xpose.msra.mxu0 %v1073_v13 }
 0x391   : > { %1107 = vmatprep.subr.bf16.mxu0 %v1076_v52 }
 0x398   : > { %1108 = vmatpush1.bf16.xpose.msra.mxu0 %v1075_v43 }
 0x399   : > { %1109 = vmatprep.subr.bf16.mxu0 %v1078_v27  ;;  %v2892_v27 = vld [vmem:[#allocation16_spill] sm:$0xff] }
 0x39a   : > { %v2893_v44 = vpack.c.bf16 %v2891_v34, %v2892_v27 }
 0x3a0   : > { %1110 = vmatpush1.bf16.xpose.msra.mxu0 %v2885_v9 }
 0x3a1   : > { %1111 = vmatprep.subr.bf16.mxu0 %v1080_v1  ;;  %v2895_v1 = vld [vmem:[#allocation18_spill] sm:$0xff] }
 0x3a2   : > { %v2896_v17 = vpack.c.bf16 %v2894_v31, %v2895_v1 }
 0x3a8   : > { %1112 = vmatpush1.bf16.xpose.msra.mxu0 %v2886_v57 }
 0x3a9   : > { %1113 = vmatprep.subr.bf16.mxu0 %v1082_v48  ;;  %v2901_v48 = vld [vmem:[#allocation6_spill] sm:$0xff] }
 0x3b0   : > { %1114 = vmatpush1.bf16.xpose.msra.mxu0 %v2888_v7 }
 0x3b1   : > { %1115 = vmatprep.subr.bf16.mxu0 %v1084_v23  ;;  %v308_v23 = vadd.f32 %v2901_v48, %v2900_v56 }
 0x3b3   : > { %v1061_v42 = vpack.c.bf16 %v308_v23, %v308_v23 }
 0x3b8   : > { %1116 = vmatpush1.bf16.xpose.msra.mxu0 %v2889_v55 }
 0x3b9   : > { %1117 = vmatprep.subr.bf16.mxu0 %v1086_v6 }
 0x3c0   : > { %1118 = vmatpush1.bf16.xpose.msra.mxu0 %v2890_v41 }
 0x3c1   : > { %1119 = vmatprep.subr.bf16.mxu0 %v1088_v25 }
 0x3c8   : > { %1120 = vmatpush1.bf16.xpose.msra.mxu0 %v2893_v44 }
 0x3c9   : > { %1121 = vmatprep.subr.bf16.mxu0 %v1090_v19  ;;  %v1143_v19 = vpop.permute.xlu0 %1142 }
 0x3d0   : > { %1122 = vmatpush1.bf16.xpose.msra.mxu0 %v2896_v17 }
 0x3d1   : > { %1123 = vmatprep.subr.bf16.mxu0 %v1092_v3 }
 0x3d8   : > { %1124 = vmatpush1.bf16.xpose.msra.mxu0 %v2897_v8 }
 0x3d9   : > { %1125 = vmatprep.subr.bf16.mxu0 %v1094_v22 }
 0x3e0   : > { %1126 = vmatpush1.bf16.xpose.msra.mxu0 %v2899_v30 }
 0x3e7   : > { %1128 = vmatmul.mubr.bf16.vlgmr.msra.gmra.mrb[8].mxu0 %v1061_v42 }
 0x4ba   : > { %v1129_v6 = vpop.f32.mrb[8].mxu0 }
 0x4bb   : > { %v1137_v25 = vpack.c.bf16 %v1129_v6, %v1129_v6  ;;  %v1131_v53 = vpop.f32.mrb[9].mxu0 }
 0x4bc   : > { %v1138_v15 = vpack.c.bf16 %v1131_v53, %v1131_v53  ;;  %v1133_v20 = vpop.f32.mrb[10].mxu0 }
 0x4bd   : > { %v1149_v47 = vsel %vm455_vm2, %v1137_v25, 0  ;;  %v1134_v50 = vpop.f32.mrb[11].mxu0 }
 0x4be   : > { %1305 = vmatprep.subr.msk.bf16.mxu1 %vm455_vm2, %v1138_v15 }
 0x4bf   : > { %1155 = vmatpush1.bf16.msra.mxu1 %v1149_v47 }
 0x4c2   : > { %1306 = vmatmul.mubr.msk.bf16.vlgmr.msra.gmra.mrb[64].mxu1 %vm406_vm3, %v1136_v16 }
 0x595   : > { %v1188_v24 = vpop.f32.mrb[64].mxu1 }
 0x596   : > { %v1189_v39 = vadd.f32 %v1188_v24, %v1143_v19  ;;  %v1190_v3 = vpop.f32.mrb[65].mxu1 }
 0x597   : > { %v1191_v22 = vadd.f32 %v1190_v3, %v1143_v19  ;;  %v1192_v62 = vpop.f32.mrb[66].mxu1 }
 0x598   : > { %v1195_v61 = vadd.f32 %v1491_v46, %v1189_v39  ;;  %v1193_v28 = vpop.f32.mrb[67].mxu1 }
 0x599   : > { %v1196_v0 = vadd.f32 %v1191_v22, %v2902_v63 }
 0x59b   : > { %v1199_v12 = vcombine.low %v1195_v61, %v1196_v0 }
 0x59d   : > { %1201 = vst [vmem:[%s217_s11] sm:$0xff] %v1199_v12 }
 0x59e   : > { %1505 = shalt.err (!%p1502_p3)
}
 0x59f   : > { %s1506_s26 = scalar_lea.hbm %s2654_s16, 128  ;;  %s1510_s7 = scalar_lea.hbm %s2701_s5, 256 }
 0x5a0   : > { %p1507_p4 = scmp.ne.s32.totalorder %s2654_s16, %s1506_s26  ;;  %p1511_p9 = scmp.lt.u32.totalorder %s2654_s16, %s2701_s5 }
 0x5a1   : > { %p1512_p10 = scmp.lt.u32.totalorder %s1510_s7, %s1506_s26  ;;  %p1514_p12 = scmp.lt.u32.totalorder %s1506_s26, %s2654_s16 }
 0x5a2   : > { %p1508_p7 = pnand %p1507_p4, %p1626_p5 }
 0x5a3   : > { %p1513_p11 = por %p1512_p10, %p1511_p9 }
 0x5a4   : > { %p1509_p8 = pneg %p1508_p7 }
 0x5a5   : > { %p1515_p13 = por %p1514_p12, %p1513_p11 }
 0x5a7   : > { %p1516_p0 = pnand %p1515_p13, %p1509_p8 }
 0x5a9   : > { %1519 = shalt.err (!%p1516_p0)
}
 0x5aa   : > { %1314 = dma.vmem_to_hbm [thread:$0]  (%p1626_p5), %s2656_s12, 128, %s2654_s16, %s1203_s13  }
 0x5ab PF: > { %p1320_p1 = scmp.ge.s32.totalorder %s1554_s21, 2  ;;  %s1229_s10 = sand.u32 1, %s1542_s18  }
 0x5ac   : > { %s1230_s11 = scalar_lea.sflag [#allocation3], %s1229_s10 }
 0x5ad   : > { %p1317_p2 = pnand %p1320_p1, %p1630_p6 }
 0x5af   : > { %1537 = dma.done.wait (!%p1317_p2), %s1230_s11, 128  }
 0x5b0   : > { %1539 = vsyncadd (!%p1317_p2), %s1230_s11, 4294967168  ;;  %p15_p3 = scmp.ge.s32.totalorder %s1613_s24, 4   ;;  %s2903_s18 = smov %s1546_s19 }
 0x5b1   : > { %s2904_s19 = smov %s1550_s20  ;;  %s2905_s20 = smov %s1624_s27 }
 0x5b2   : > { %s2906_s21 = smov %s1613_s24  ;;  %17 = sbr.rel (!%p15_p3) target bundleno = 3 (0x3), region = 75 }
 0x5b9   :  { %1235 = vsyncpa [#allocation3], 1 }
 0x5ba   :  { %1237 = vsyncpa [#allocation3 + $0x1], 1 }

</bundles_post_ra>
